<compile_context>
chip_gen: v5e
topology: v5e:2x2
jax: 0.10.0
libtpu: 0.0.40
codegen_flags: <defaults>
</compile_context>

<pallas_src>
import math
import functools

import jax
import jax.numpy as jnp
from jax.experimental import pallas as pl
from jax.experimental.pallas import tpu as pltpu

BN_EPS = 1e-5
MAX_TK = 4608          # largest K in this net (3*3*512); single k step everywhere.


def _round_up(x, m):
    return (x + m - 1) // m * m


# ---------------------------------------------------------------------------
# Pallas matmul kernel with fused bias / residual-add / ReLU epilogue
# ---------------------------------------------------------------------------
def _mm_kernel(a_ref, b_ref, bias_ref, *rest, relu, has_residual):
    if has_residual:
        r_ref, o_ref, acc_ref = rest
    else:
        o_ref, acc_ref = rest
    k = pl.program_id(2)

    @pl.when(k == 0)
    def _():
        acc_ref[...] = jnp.zeros_like(acc_ref)

    # bf16 operands on the MXU, f32 accumulation.
    acc_ref[...] += jnp.dot(a_ref[...], b_ref[...],
                            preferred_element_type=jnp.float32)

    @pl.when(k == pl.num_programs(2) - 1)
    def _():
        # Keep the epilogue in f32 (v5e VPU has no bf16 path).
        y = acc_ref[...] + bias_ref[...]
        if has_residual:
            y = y + r_ref[...]
        if relu:
            y = jnp.maximum(y, 0.0)
        o_ref[...] = y.astype(o_ref.dtype)


def matmul_bias(a, b, bias, relu=False, residual=None):
    """(a @ b) + bias (per output column) [+ residual], optional ReLU.

    a: [M, K] f32, b: [K, N] f32 (BN scale already folded into b),
    bias: [N] f32, residual: optional [M, N] f32. Returns [M, N] f32.
    Operands are cast to bf16 for the MXU; accumulation/epilogue stay f32.
    """
    M, K = a.shape
    K2, N = b.shape
    assert K == K2

    # Adaptive M tile: never pad small M up to 128.
    if M >= 128:
        TM = 128
    else:
        TM = _round_up(M, 8)
    Mp = _round_up(M, TM)

    # N tile: 256 to match the 2x256^2 MXU on v6e/v7x when it divides cleanly,
    # else 128 (optimal on v5e's 4x128^2 MXU).
    Np128 = _round_up(N, 128)
    TN = 256 if (Np128 >= 256 and Np128 % 256 == 0) else 128
    Np = _round_up(N, TN)

    # Full-K tile (single k grid step) for every conv in this network.
    Kp128 = _round_up(K, 128)
    TK = Kp128 if Kp128 <= MAX_TK else 2048
    Kp = _round_up(K, TK)

    a_p = jnp.pad(a.astype(jnp.bfloat16), ((0, Mp - M), (0, Kp - K)))
    b_p = jnp.pad(b.astype(jnp.bfloat16), ((0, Kp - K), (0, Np - N)))
    bias_p = jnp.pad(bias.astype(jnp.float32), (0, Np - N)).reshape(1, Np)

    in_specs = [
        pl.BlockSpec((TM, TK), lambda i, j, k: (i, k)),
        pl.BlockSpec((TK, TN), lambda i, j, k: (k, j)),
        pl.BlockSpec((1, TN), lambda i, j, k: (0, j)),
    ]
    args = [a_p, b_p, bias_p]
    has_residual = residual is not None
    if has_residual:
        r_p = jnp.pad(residual.astype(jnp.float32), ((0, Mp - M), (0, Np - N)))
        in_specs.append(pl.BlockSpec((TM, TN), lambda i, j, k: (i, j)))
        args.append(r_p)

    grid = (Mp // TM, Np // TN, Kp // TK)
    out = pl.pallas_call(
        functools.partial(_mm_kernel, relu=relu, has_residual=has_residual),
        out_shape=jax.ShapeDtypeStruct((Mp, Np), jnp.float32),
        grid_spec=pltpu.PrefetchScalarGridSpec(
            num_scalar_prefetch=0,
            grid=grid,
            in_specs=in_specs,
            out_specs=pl.BlockSpec((TM, TN), lambda i, j, k: (i, j)),
            scratch_shapes=[pltpu.VMEM((TM, TN), jnp.float32)],
        ),
        compiler_params=pltpu.CompilerParams(
            dimension_semantics=("parallel", "parallel", "arbitrary")),
    )(*args)
    return out[:M, :N]


# ---------------------------------------------------------------------------
# MaxPool kernel (lane-dense flattened layout)
# ---------------------------------------------------------------------------
def _maxpool_kernel(x_ref, o_ref):
    m = x_ref[0]
    for i in range(1, x_ref.shape[0]):
        m = jnp.maximum(m, x_ref[i])
    o_ref[...] = m


def maxpool_3x3_s2_p1(x):
    """MaxPool2d(kernel=3, stride=2, padding=1) on NHWC input."""
    n, h, w, c = x.shape
    oh = (h + 2 - 3) // 2 + 1
    ow = (w + 2 - 3) // 2 + 1
    xp = jnp.pad(x, ((0, 0), (1, 1), (1, 1), (0, 0)),
                 constant_values=-jnp.inf)
    wins = [xp[:, a:a + 2 * (oh - 1) + 1:2, b:b + 2 * (ow - 1) + 1:2, :]
            for a in range(3) for b in range(3)]
    total = n * oh * ow * c
    stacked = jnp.stack(wins, axis=0).reshape(9, total)
    tp = _round_up(total, 8 * 128)                       # unmasked (rows, 128) stores
    stacked = jnp.pad(stacked, ((0, 0), (0, tp - total)),
                      constant_values=-jnp.inf).reshape(9, tp // 128, 128)
    out = pl.pallas_call(
        _maxpool_kernel,
        out_shape=jax.ShapeDtypeStruct((tp // 128, 128), jnp.float32),
    )(stacked)
    return out.reshape(tp)[:total].reshape(n, oh, ow, c)


# ---------------------------------------------------------------------------
# Conv / deconv wrappers (NHWC im2col glue in JAX, matmul in Pallas)
# ---------------------------------------------------------------------------
def conv2d(x, w, stride=1, padding=0, scale=None, bias=None, relu=False,
           residual=None):
    """NHWC conv. w is PyTorch-layout [OC, IC, KH, KW]. BN scale is folded into
    the weight matrix; bias / residual / ReLU fused in the matmul epilogue."""
    n, h, wd, c = x.shape
    oc, ic, kh, kw = w.shape
    oh = (h + 2 * padding - kh) // stride + 1
    ow = (wd + 2 * padding - kw) // stride + 1

    # TODO(synk): im2col still materializes KH*KW*C patches in HBM (channel
    # concat, no transposes); a tap-axis grid with shifted-window index_map
    # would remove this copy entirely.
    if kh == 1 and kw == 1 and padding == 0:
        xs = x[:, ::stride, ::stride, :] if stride != 1 else x
        p = xs.reshape(n * oh * ow, c)
    else:
        xp = jnp.pad(x, ((0, 0), (padding, padding), (padding, padding), (0, 0)))
        taps = []
        for a in range(kh):
            for b in range(kw):
                taps.append(xp[:, a:a + stride * (oh - 1) + 1:stride,
                               b:b + stride * (ow - 1) + 1:stride, :])
        p = jnp.concatenate(taps, axis=-1).reshape(n * oh * ow, kh * kw * c)

    wr = w.transpose(2, 3, 1, 0).reshape(kh * kw * ic, oc)   # [KH*KW*C, OC]
    if scale is not None:
        wr = wr * scale[None, :]                              # fold BN scale
    if bias is None:
        bias = jnp.zeros((oc,), jnp.float32)
    res_flat = None if residual is None else residual.reshape(n * oh * ow, oc)
    y = matmul_bias(p, wr, bias, relu=relu, residual=res_flat)
    return y.reshape(n, oh, ow, oc)


def deconv_2x2_s2(x, w, scale, bias, relu=True):
    """ConvTranspose2d(kernel=2, stride=2, pad=0) + folded BN + ReLU, NHWC."""
    n, h, wd, c = x.shape
    ic, oc, _, _ = w.shape
    xf = x.reshape(n * h * wd, c)
    wr = w.reshape(ic, oc * 4) * jnp.repeat(scale, 4)[None, :]   # fold BN scale
    y = matmul_bias(xf, wr, jnp.repeat(bias, 4), relu=relu)
    y = y.reshape(n, h, wd, oc, 2, 2).transpose(0, 1, 4, 2, 5, 3)
    return y.reshape(n, 2 * h, 2 * wd, oc)


def _bilinear_matrix(in_size, out_size):
    # PyTorch F.interpolate(mode='bilinear', align_corners=False) semantics.
    o = jnp.arange(out_size, dtype=jnp.float32)
    src = (o + 0.5) * (in_size / out_size) - 0.5
    src = jnp.maximum(src, 0.0)
    i0 = jnp.minimum(jnp.floor(src).astype(jnp.int32), in_size - 1)
    i1 = jnp.minimum(i0 + 1, in_size - 1)
    lam = src - i0.astype(jnp.float32)
    return (jax.nn.one_hot(i0, in_size) * (1.0 - lam)[:, None] +
            jax.nn.one_hot(i1, in_size) * lam[:, None])        # [out, in]


def bilinear_upsample(x, out_h, out_w):
    # TODO(synk): negligible-FLOP resize kept in plain XLA per perf review
    # (128-padded Pallas tiles are pure overhead here).
    rh = _bilinear_matrix(x.shape[1], out_h)                   # [out_h, H]
    rw = _bilinear_matrix(x.shape[2], out_w)                   # [out_w, W]
    y = jnp.einsum('nhwc,oh->nowc', x, rh)
    y = jnp.einsum('nowc,pw->nopc', y, rw)
    return y


# ---------------------------------------------------------------------------
# Parameters (deterministic synthetic init following weights_init)
# ---------------------------------------------------------------------------
def _bn_fold(c):
    # TODO(synk): BatchNorm realized in inference mode (running_mean=0,
    # running_var=1, gamma=1, beta=0) rather than training-mode batch stats.
    scale = jnp.full((c,), 1.0 / math.sqrt(1.0 + BN_EPS), jnp.float32)
    bias = jnp.zeros((c,), jnp.float32)
    return scale, bias


def init_params(key, in_ch=3):
    keys = iter(jax.random.split(key, 64))

    def conv_w(oc, ic, kh, kw):
        std = math.sqrt(2.0 / (kh * kw * oc))
        return jax.random.normal(next(keys), (oc, ic, kh, kw), jnp.float32) * std

    def deconv_w(ic, oc, k):
        std = math.sqrt(2.0 / (k * k * ic))
        return jax.random.normal(next(keys), (ic, oc, k, k), jnp.float32) * std

    def make_layer(in_c, out_c, stride):
        b0 = {'conv1': conv_w(out_c, in_c, 3, 3), 'bn1': _bn_fold(out_c),
              'conv2': conv_w(out_c, out_c, 3, 3), 'bn2': _bn_fold(out_c),
              'stride': stride}
        if stride != 1 or in_c != out_c:
            b0['down_conv'] = conv_w(out_c, in_c, 1, 1)
            b0['down_bn'] = _bn_fold(out_c)
        b1 = {'conv1': conv_w(out_c, out_c, 3, 3), 'bn1': _bn_fold(out_c),
              'conv2': conv_w(out_c, out_c, 3, 3), 'bn2': _bn_fold(out_c),
              'stride': 1}
        return [b0, b1]

    p = {
        'conv1': conv_w(64, in_ch, 7, 7), 'bn1': _bn_fold(64),
        'layer1': make_layer(64, 64, 1),
        'layer2': make_layer(64, 128, 2),
        'layer3': make_layer(128, 256, 2),
        'layer4': make_layer(256, 512, 2),
        'conv2': conv_w(256, 512, 1, 1), 'bn2': _bn_fold(256),
    }
    dec, cin = [], 256
    for _ in range(4):
        cout = cin // 2
        dec.append({'w': deconv_w(cin, cout, 2), 'bn': _bn_fold(cout)})
        cin = cout
    p['decoder'] = dec
    p['conv3'] = conv_w(1, 16, 3, 3)
    return p


# ---------------------------------------------------------------------------
# Forward pass (ResNet.forward semantics, resnet18 encoder + deconv2 decoder)
# ---------------------------------------------------------------------------
def basic_block(x, b):
    s1, bi1 = b['bn1']
    s2, bi2 = b['bn2']
    out = conv2d(x, b['conv1'], stride=b['stride'], padding=1,
                 scale=s1, bias=bi1, relu=True)
    if 'down_conv' in b:
        ds, dbi = b['down_bn']
        identity = conv2d(x, b['down_conv'], stride=b['stride'], padding=0,
                          scale=ds, bias=dbi, relu=False)
    else:
        identity = x
    # residual add + ReLU fused into the second conv's matmul epilogue
    return conv2d(out, b['conv2'], stride=1, padding=1,
                  scale=s2, bias=bi2, relu=True, residual=identity)


def resnet_forward(params, x, output_size):
    x = x.transpose(0, 2, 3, 1)                             # NCHW -> NHWC once
    s, bi = params['bn1']
    x = conv2d(x, params['conv1'], stride=2, padding=3,
               scale=s, bias=bi, relu=True)                 # conv1+bn1+relu
    x = maxpool_3x3_s2_p1(x)                                # maxpool
    for layer in ('layer1', 'layer2', 'layer3', 'layer4'):  # encoders
        for b in params[layer]:
            x = basic_block(x, b)
    s, bi = params['bn2']
    x = conv2d(x, params['conv2'], stride=1, padding=0,
               scale=s, bias=bi, relu=False)                # conv2+bn2
    for d in params['decoder']:                             # 4x deconv+bn+relu
        ds, dbi = d['bn']
        x = deconv_2x2_s2(x, d['w'], scale=ds, bias=dbi, relu=True)
    x = conv2d(x, params['conv3'], stride=1, padding=1, relu=False)  # conv3
    x = bilinear_upsample(x, output_size[0], output_size[1])         # upsample
    return x.transpose(0, 3, 1, 2)                          # NHWC -> NCHW once


if __name__ == "__main__":
    key = jax.random.PRNGKey(0)
    pkey, xkey = jax.random.split(key)
    params = init_params(pkey, in_ch=3)
    x = jax.random.normal(xkey, (2, 3, 32, 32), jnp.float32)   # NCHW
    out = resnet_forward(params, x, output_size=(64, 64))
    out = jax.block_until_ready(out)
    assert out.shape == (2, 1, 64, 64), out.shape
    assert bool(jnp.all(jnp.isfinite(out)))
    print("KERNEL_OK")
</pallas_src>

<mosaic_0001>
module attributes {stable_mosaic.version = 11 : i64} {
  func.func @_mm_kernel(%arg0: i32, %arg1: i32, %arg2: i32, %arg3: memref<128x256xbf16, #tpu.memory_space<vmem>>, %arg4: memref<256x128xbf16, #tpu.memory_space<vmem>>, %arg5: memref<1x128xf32, #tpu.memory_space<vmem>>, %arg6: memref<128x128xf32, #tpu.memory_space<vmem>>, %arg7: memref<128x128xf32, #tpu.memory_space<vmem>>) attributes {dimension_semantics = [#tpu.dimension_semantics<parallel>, #tpu.dimension_semantics<parallel>, #tpu.dimension_semantics<arbitrary>], iteration_bounds = array<i64: 4, 1, 1>, scalar_prefetch = 0 : i64, scratch_operands = 1 : i64, tpu.core_type = #tpu.core_type<tc>, window_params = [{transform_indices = @transform_0, window_bounds = array<i64: 128, 256>}, {transform_indices = @transform_1, window_bounds = array<i64: 256, 128>}, {transform_indices = @transform_2, window_bounds = array<i64: 1, 128>}, {transform_indices = @transform_3, window_bounds = array<i64: 128, 128>}]} {
    %c0_i32 = arith.constant 0 : i32
    %0 = arith.cmpi eq, %arg2, %c0_i32 : i32
    %1 = arith.extui %0 : i1 to i32
    %c0_i32_0 = arith.constant 0 : i32
    %2 = arith.cmpi ne, %1, %c0_i32_0 : i32
    scf.if %2 {
      %cst_10 = arith.constant 0.000000e+00 : f32
      %12 = vector.broadcast %cst_10 : f32 to vector<128x128xf32>
      %c0_11 = arith.constant 0 : index
      %c0_12 = arith.constant 0 : index
      %13 = vector.load %arg7[%c0_11, %c0_12] : memref<128x128xf32, #tpu.memory_space<vmem>>, vector<128x128xf32>
      tpu.vector_store %arg7[%c0_11, %c0_12], %12 {strides = array<i32>} : memref<128x128xf32, #tpu.memory_space<vmem>>, vector<128x128xf32>,
    } else {
    }
    %c0 = arith.constant 0 : index
    %c0_1 = arith.constant 0 : index
    %3 = vector.load %arg7[%c0, %c0_1] : memref<128x128xf32, #tpu.memory_space<vmem>>, vector<128x128xf32>
    %c0_2 = arith.constant 0 : index
    %c0_3 = arith.constant 0 : index
    %4 = vector.load %arg3[%c0_2, %c0_3] : memref<128x256xbf16, #tpu.memory_space<vmem>>, vector<128x256xbf16>
    %c0_4 = arith.constant 0 : index
    %c0_5 = arith.constant 0 : index
    %5 = vector.load %arg4[%c0_4, %c0_5] : memref<256x128xbf16, #tpu.memory_space<vmem>>, vector<256x128xbf16>
    %cst = arith.constant dense<0.000000e+00> : vector<128x128xf32>
    %6 = tpu.matmul %4, %5, %cst {dimension_numbers = #tpu.dot_dimension_numbers<[1], [0], [0], [1], [0, 0, 1, 1], [], []>} : vector<128x256xbf16>, vector<256x128xbf16>, vector<128x128xf32> -> vector<128x128xf32>
    %7 = arith.addf %3, %6 : vector<128x128xf32>
    %c0_6 = arith.constant 0 : index
    %c0_7 = arith.constant 0 : index
    %8 = vector.load %arg7[%c0_6, %c0_7] : memref<128x128xf32, #tpu.memory_space<vmem>>, vector<128x128xf32>
    tpu.vector_store %arg7[%c0_6, %c0_7], %7 {strides = array<i32>} : memref<128x128xf32, #tpu.memory_space<vmem>>, vector<128x128xf32>,
    %c0_i32_8 = arith.constant 0 : i32
    %9 = arith.cmpi eq, %arg2, %c0_i32_8 : i32
    %10 = arith.extui %9 : i1 to i32
    %c0_i32_9 = arith.constant 0 : i32
    %11 = arith.cmpi ne, %10, %c0_i32_9 : i32
    scf.if %11 {
      %c0_10 = arith.constant 0 : index
      %c0_11 = arith.constant 0 : index
      %12 = vector.load %arg7[%c0_10, %c0_11] : memref<128x128xf32, #tpu.memory_space<vmem>>, vector<128x128xf32>
      %c0_12 = arith.constant 0 : index
      %c0_13 = arith.constant 0 : index
      %13 = vector.load %arg5[%c0_12, %c0_13] : memref<1x128xf32, #tpu.memory_space<vmem>>, vector<1x128xf32>
      %14 = vector.broadcast %13 : vector<1x128xf32> to vector<128x128xf32>
      %15 = arith.addf %12, %14 : vector<128x128xf32>
      %cst_14 = arith.constant 0.000000e+00 : f32
      %16 = vector.broadcast %cst_14 : f32 to vector<128x128xf32>
      %17 = arith.maximumf %15, %16 : vector<128x128xf32>
      %c0_15 = arith.constant 0 : index
      %c0_16 = arith.constant 0 : index
      %18 = vector.load %arg6[%c0_15, %c0_16] : memref<128x128xf32, #tpu.memory_space<vmem>>, vector<128x128xf32>
      tpu.vector_store %arg6[%c0_15, %c0_16], %17 {strides = array<i32>} : memref<128x128xf32, #tpu.memory_space<vmem>>, vector<128x128xf32>,
    } else {
    }
    return
  }
  func.func @transform_0(%arg0: i32, %arg1: i32, %arg2: i32) -> (i32, i32) {
    %c0_i32 = arith.constant 0 : i32
    return %arg0, %arg2 : i32, i32
  }
  func.func @transform_1(%arg0: i32, %arg1: i32, %arg2: i32) -> (i32, i32) {
    %c0_i32 = arith.constant 0 : i32
    return %arg2, %arg1 : i32, i32
  }
  func.func @transform_2(%arg0: i32, %arg1: i32, %arg2: i32) -> (i32, i32) {
    %c0_i32 = arith.constant 0 : i32
    %c0_i32_0 = arith.constant 0 : i32
    return %c0_i32, %arg1 : i32, i32
  }
  func.func @transform_3(%arg0: i32, %arg1: i32, %arg2: i32) -> (i32, i32) {
    %c0_i32 = arith.constant 0 : i32
    return %arg0, %arg1 : i32, i32
  }
}

</mosaic_0001>

<bundles_post_ra>
// kernel: tpu_custom_call.1
= control target key start
LH: loop header
LB: loop body
LE: loop exit
PB: predicated region body
PF: predicated region fallthrough
CT: control target
= control target key end

     0   :  { %s1534_s0 = inlined_call_operand.hbm [shape: bf16[512,256], index: 0, kind: input, shape index: {}]   ;;  %s1535_s1 = inlined_call_operand.hbm [shape: bf16[256,128], index: 1, kind: input, shape index: {}]   ;;  %s1536_s2 = inlined_call_operand.vmem [shape: f32[1,128], index: 2, kind: input, shape index: {}]   ;;  %s1537_s3 = inlined_call_operand.hbm [shape: f32[512,128], index: 3, kind: output, shape index: {}]  }
   0x1   :  { %1538 = sst [smem:[#allocation12_spill]] %s1535_s1 }
   0x2   :  { %8 = vsyncpa [#allocation4], 0 }
   0x3   :  { %10 = vsyncpa [#allocation4 + $0x1], 0 }
   0x4   :  { %11 = vsyncpa [#allocation7], 0 }
   0x5   :  { %12 = vsyncpa [#allocation5], 0 }
   0x6   :  { %14 = vsyncpa [#allocation5 + $0x1], 0  ;;  %s1309_s12 = smov 0   ;;  %s1311_s13 = smov 0  }
   0x7   :  { %s1313_s14 = smov 0   ;;  %s1315_s15 = smov 0  }
   0x8   :  { %s1317_s16 = smov 0   ;;  %s1319_s17 = smov 0  }
   0x9 LB: > { %s856_s18 = sadd.s32 4294967295, %s1280_s17   ;;  %s857_s19 = sadd.s32 4294967294, %s1280_s17   ;;  %s1280_s17 = sphi %s1319_s17, %s20_s17   ;;  %s1276_s16 = sphi %s1317_s16, %s1551_s16   ;;  %s1272_s15 = sphi %s1315_s15, %s1550_s15   ;;  %s1268_s14 = sphi %s1313_s14, %s1549_s14   ;;  %s1264_s13 = sphi %s1311_s13, %s1548_s13   ;;  %s1260_s12 = sphi %s1309_s12, %s1547_s12  }
   0xa   : > { %p61_p0 = scmp.ne.s32.totalorder %s1264_s13, %s1260_s12  ;;  %p1343_p1 = scmp.eq.s32.totalorder %s856_s18, 0 }
   0xb   : > { %p1347_p2 = scmp.eq.s32.totalorder %s856_s18, 3  ;;  %p147_p3 = scmp.eq.s32.totalorder %s857_s19, 3 }
   0xc   : > { %p1353_p4 = por %p1343_p1, %p61_p0  ;;  %p858_p5 = scmp.ge.s32.totalorder %s1280_s17, 1 }
   0xd   : > { %p1358_p6 = por %p147_p3, %p61_p0  ;;  %p154_p7 = scmp.lt.s32.totalorder %s1280_s17, 5 }
   0xe   : > { %s1543_s1 = sld [smem:[#allocation12_spill]]  ;;  %s1282_s28 = smov [#allocation6]  }
   0xf   : > { %p1366_p8 = pnand %p858_p5, %p154_p7  ;;  %s171_s29 = sshll.u32 %s1282_s28, 4  ;;  %s172_s29 = int_to_ptr.vmem [resolvable:$true] %s171_s29 }
  0x10   : > { %s1283_s30 = smov 64   ;;  %s1284_s4 = smov 4  }
  0x11   : > { %p1062_p9 = pneg %p1366_p8  ;;  %s39_s5 = sadd.s32 1, %s1276_s16 }
  0x12   : > { %p41_p11 = scmp.ge.s32.totalorder %s39_s5, 4  ;;  %s48_s6 = sadd.s32 1, %s1268_s14 }
  0x13   : > { %p1063_p10 = pnand %p1062_p9, %p1343_p1  ;;  %p55_p12 = scmp.ne.s32.totalorder %s1268_s14, %s1264_s13 }
  0x14   : > { %s169_s26 = sshll.u32 %s1543_s1, 4  ;;  %p56_p13 = scmp.eq.s32.totalorder %s1280_s17, 0  ;;  %s170_s26 = int_to_ptr.hbm [resolvable:$true] %s169_s26 }
  0x15   : > { %1065 = dma.hbm_to_vmem [thread:$0]  (!%p1063_p10), %s170_s26, 2048, %s172_s29, [#allocation7], %s1283_s30, %s1283_s30, %s1284_s4  }
  0x16   : > { %s1553_s5 = smov (%p41_p11, %s39_s5), 0  ;;  %p1381_p0 = por %p56_p13, %p55_p12 }
  0x17   : > { %p1387_p3 = por %p1347_p2, %p55_p12  ;;  %s43_s9 = ssub.s32 %s1276_s16, %s1553_s5 }
  0x18   : > { %p1075_p5 = scmp.lt.s32.totalorder %s1280_s17, 4  ;;  %p46_p7 = scmp.eq.s32.totalorder %s43_s9, 0 }
  0x19   : > { %s191_s10 = sand.u32 1, %s1268_s14   ;;  %s1004_s19 = sshll.u32 %s1276_s16, 7 }
  0x1a   : > { %s862_s11 = sshll.u32 %s191_s10, 7  ;;  %s203_s26 = scalar_lea.hbm %s1534_s0, %s1004_s19 }
  0x1b   : > { %s1396_s18 = scalar_select %p46_p7, %s1268_s14, %s48_s6  }
  0x1c   : > { %s195_s28 = scalar_lea.vmem [#allocation3], %s862_s11  ;;  %s204_s21 = sshll.u32 %s203_s26, 4  ;;  %s205_s21 = int_to_ptr.hbm [resolvable:$true] %s204_s21 }
  0x1d   : > { %s206_s29 = sshll.u32 %s195_s28, 4  ;;  %p1067_p2 = pnand %p1075_p5, %p1381_p0  ;;  %s207_s29 = int_to_ptr.vmem [resolvable:$true] %s206_s29 }
  0x1e   : > { %s192_s30 = scalar_lea.sflag [#allocation4], %s191_s10  ;;  %s1285_s4 = smov 128  }
  0x1f   : > { %s1286_s1 = smov 8   ;;  %218 = sbr.rel (%p1366_p8) target bundleno = 270 (0x10e), region = 32 }
  0x20   : > { %1069 = dma.hbm_to_vmem [thread:$0]  (!%p1067_p2), %s205_s21, 2048, %s207_s29, %s192_s30, %s1285_s4, %s1285_s4, %s1286_s1  }
  0x21   : > { %s1407_s6 = sand.u32 (!%p1366_p8), 1, %s1264_s13  }
  0x22   : > { %s867_s9 = sshll.u32 (!%p1366_p8), %s1407_s6, 7  ;;  %s221_s11 = scalar_lea.sflag (!%p1366_p8), [#allocation4], %s1407_s6 }
  0x23   : > { %s1413_s19 = scalar_lea.vmem (!%p1366_p8), [#allocation3], %s867_s9 }
  0x24   : > { %1247 = dma.done.wait (%p1353_p4), %s221_s11, 2048  }
  0x25   : > { %1249 = vsyncadd (%p1353_p4), %s221_s11, 4294965248 }
  0x26   : > { %1251 = dma.done.wait (%p1343_p1), [#allocation7], 2048  }
  0x27   : > { %1253 = vsyncadd (%p1343_p1), [#allocation7], 4294965248  ;;  %v1028_v0 = vld [vmem:[#allocation6 + $0x38] sm:$0xff]  ;;  %v1027_v2 = vld [vmem:[#allocation6 + $0x30] sm:$0xff]  ;;  %s1463_s22 = scalar_lea.vmem [#allocation8], %s867_s9  ;;  %s1037_s27 = sshll.u32 %s1272_s15, 7 }
  0x28   : > { %v1036_v1 = vld [vmem:[#allocation6 + $0x78] sm:$0xff]  ;;  %523 = vmatpush.bf16.msra.mxu0 %v1028_v0  ;;  %1038 = vmatpush.bf16.msra.mxu2 %v1028_v0  ;;  %v1035_v3 = vld [vmem:[#allocation6 + $0x70] sm:$0xff]  ;;  %v1026_v4 = vld [vmem:[#allocation6 + $0x28] sm:$0xff]  ;;  %s737_s24 = scalar_lea.hbm %s1537_s3, %s1037_s27  ;;  %s738_s25 = sshll.u32 %s1463_s22, 4  ;;  %s739_s25 = int_to_ptr.vmem [resolvable:$true] %s738_s25 }
  0x29   : > { %572 = vmatpush.bf16.msra.mxu1 %v1036_v1  ;;  %1046 = vmatpush.bf16.msra.mxu3 %v1036_v1  ;;  %v1034_v5 = vld [vmem:[#allocation6 + $0x68] sm:$0xff]  ;;  %v1025_v6 = vld [vmem:[#allocation6 + $0x20] sm:$0xff]  ;;  %v1024_v8 = vld [vmem:[#allocation6 + $0x18] sm:$0xff]  ;;  %s740_s26 = sshll.u32 %s737_s24, 4  ;;  %s725_s15 = scalar_lea.sflag [#allocation5], %s1407_s6  ;;  %s741_s26 = int_to_ptr.hbm [resolvable:$true] %s740_s26 }
  0x2a   : > { %v1033_v7 = vld [vmem:[#allocation6 + $0x60] sm:$0xff]  ;;  %v1032_v9 = vld [vmem:[#allocation6 + $0x58] sm:$0xff]  ;;  %v1023_v10 = vld [vmem:[#allocation6 + $0x10] sm:$0xff]  ;;  %s1208_s28 = sshra.s32 %s741_s26, 4  ;;  %s1214_s4 = scalar_lea.hbm %s1537_s3, 512  ;;  %s1209_s28 = int_to_ptr.hbm [resolvable:$true] %s1208_s28 }
  0x2b   : > { %v1031_v11 = vld [vmem:[#allocation6 + $0x50] sm:$0xff]  ;;  %v1022_v12 = vld [vmem:[#allocation6 + $0x8] sm:$0xff]  ;;  %v1021_v14 = vld [vmem:[#allocation6] sm:$0xff]  ;;  %s1210_s29 = scalar_lea.hbm %s1209_s28, 128  ;;  %p1215_p9 = scmp.lt.s32.totalorder %s1209_s28, %s1537_s3 }
  0x2c   : > { %524 = vmatpush.bf16.msra.mxu0 %v1027_v2  ;;  %1039 = vmatpush.bf16.msra.mxu2 %v1027_v2  ;;  %v1030_v13 = vld [vmem:[#allocation6 + $0x48] sm:$0xff]  ;;  %v1029_v15 = vld [vmem:[#allocation6 + $0x40] sm:$0xff]  ;;  %v880_v28 = vld [vmem:[%s1413_s19 + $0x10] sm:$0xf]  ;;  %p1211_p1 = scmp.ne.s32.totalorder %s1209_s28, %s1210_s29  ;;  %p1216_p10 = scmp.lt.s32.totalorder %s1214_s4, %s1210_s29 }
  0x2d   : > { %573 = vmatpush.bf16.msra.mxu1 %v1035_v3  ;;  %1047 = vmatpush.bf16.msra.mxu3 %v1035_v3  ;;  %v872_v16 = vld [vmem:[%s1413_s19] sm:$0xf]  ;;  %v1006_v17 = vld [vmem:[%s1413_s19 + $0x4] sm:$0xf0]  ;;  %v1005_v20 = vld [vmem:[%s1413_s19 + $0x4] sm:$0xf] }
  0x2e   : > { %v904_v18 = vld [vmem:[%s1413_s19 + $0x40] sm:$0xf]  ;;  %v1014_v19 = vld [vmem:[%s1413_s19 + $0x44] sm:$0xf0]  ;;  %v874_v21 = vld [vmem:[%s1413_s19 + $0x8] sm:$0xf0]  ;;  %v873_v24 = vor.u32 %v1006_v17, %v872_v16  ;;  %p1212_p4 = pnand %p1211_p1, %p1387_p3  ;;  %p1217_p11 = por %p1216_p10, %p1215_p9 }
  0x2f   : > { %v1013_v22 = vld [vmem:[%s1413_s19 + $0x44] sm:$0xf]  ;;  %v906_v23 = vld [vmem:[%s1413_s19 + $0x48] sm:$0xf0]  ;;  %v905_v25 = vor.u32 %v1014_v19, %v904_v18  ;;  %v877_v26 = vor.u32 %v1005_v20, %v874_v21  ;;  %v1008_v29 = vld [vmem:[%s1413_s19 + $0x14] sm:$0xf0] }
  0x30   : > { %525 = vmatpush.bf16.msra.mxu0 %v1026_v4  ;;  %1040 = vmatpush.bf16.msra.mxu2 %v1026_v4  ;;  %v909_v27 = vor.u32 %v1013_v22, %v906_v23  ;;  %v912_v30 = vld [vmem:[%s1413_s19 + $0x50] sm:$0xf]  ;;  %v1016_v31 = vld [vmem:[%s1413_s19 + $0x54] sm:$0xf0]  ;;  %v1007_v32 = vld [vmem:[%s1413_s19 + $0x14] sm:$0xf]  ;;  %v881_v36 = vor.u32 %v1008_v29, %v880_v28  ;;  %p1213_p8 = pneg %p1212_p4 }
  0x31   : > { %574 = vmatpush.bf16.msra.mxu1 %v1034_v5  ;;  %1048 = vmatpush.bf16.msra.mxu3 %v1034_v5  ;;  %v882_v33 = vld [vmem:[%s1413_s19 + $0x18] sm:$0xf0]  ;;  %v1015_v34 = vld [vmem:[%s1413_s19 + $0x54] sm:$0xf]  ;;  %v913_v37 = vor.u32 %v1016_v31, %v912_v30  ;;  %v888_v40 = vld [vmem:[%s1413_s19 + $0x20] sm:$0xf] }
  0x32   : > { %v914_v35 = vld [vmem:[%s1413_s19 + $0x58] sm:$0xf0]  ;;  %v885_v38 = vor.u32 %v1007_v32, %v882_v33  ;;  %v1010_v41 = vld [vmem:[%s1413_s19 + $0x24] sm:$0xf0]  ;;  %v920_v42 = vld [vmem:[%s1413_s19 + $0x60] sm:$0xf]  ;;  %p1218_p12 = pnand %p1217_p11, %p1213_p8 }
  0x33   : > { %v917_v39 = vor.u32 %v1015_v34, %v914_v35  ;;  %v1018_v43 = vld [vmem:[%s1413_s19 + $0x64] sm:$0xf0]  ;;  %v1009_v44 = vld [vmem:[%s1413_s19 + $0x24] sm:$0xf]  ;;  %v890_v45 = vld [vmem:[%s1413_s19 + $0x28] sm:$0xf0]  ;;  %v889_v48 = vor.u32 %v1010_v41, %v888_v40 }
  0x34   : > { %526 = vmatpush.bf16.msra.mxu0 %v1025_v6  ;;  %1041 = vmatpush.bf16.msra.mxu2 %v1025_v6  ;;  %v1017_v46 = vld [vmem:[%s1413_s19 + $0x64] sm:$0xf]  ;;  %v922_v47 = vld [vmem:[%s1413_s19 + $0x68] sm:$0xf0]  ;;  %v921_v49 = vor.u32 %v1018_v43, %v920_v42  ;;  %v893_v50 = vor.u32 %v1009_v44, %v890_v45  ;;  %v896_v52 = vld [vmem:[%s1413_s19 + $0x30] sm:$0xf] }
  0x35   : > { %575 = vmatpush.bf16.msra.mxu1 %v1033_v7  ;;  %1049 = vmatpush.bf16.msra.mxu3 %v1033_v7  ;;  %v925_v51 = vor.u32 %v1017_v46, %v922_v47  ;;  %v1012_v53 = vld [vmem:[%s1413_s19 + $0x34] sm:$0xf0]  ;;  %v928_v54 = vld [vmem:[%s1413_s19 + $0x70] sm:$0xf]  ;;  %v1011_v56 = vld [vmem:[%s1413_s19 + $0x34] sm:$0xf] }
  0x36   : > { %v1020_v55 = vld [vmem:[%s1413_s19 + $0x74] sm:$0xf0]  ;;  %v898_v57 = vld [vmem:[%s1413_s19 + $0x38] sm:$0xf0]  ;;  %v1019_v58 = vld [vmem:[%s1413_s19 + $0x74] sm:$0xf]  ;;  %v897_v60 = vor.u32 %v1012_v53, %v896_v52 }
  0x37   : > { %v930_v59 = vld [vmem:[%s1413_s19 + $0x78] sm:$0xf0]  ;;  %v929_v61 = vor.u32 %v1020_v55, %v928_v54  ;;  %v901_v62 = vor.u32 %v1011_v56, %v898_v57  ;;  %v1458_v1 = vld [vmem:[%s1536_s2] ss:$0 sm:$0xff] }
  0x38   : > { %527 = vmatpush.bf16.msra.mxu0 %v1024_v8  ;;  %1042 = vmatpush.bf16.msra.mxu2 %v1024_v8  ;;  %v933_v63 = vor.u32 %v1019_v58, %v930_v59 }
  0x39   : > { %576 = vmatpush.bf16.msra.mxu1 %v1032_v9  ;;  %1050 = vmatpush.bf16.msra.mxu3 %v1032_v9 }
  0x3c   : > { %528 = vmatpush.bf16.msra.mxu0 %v1023_v10  ;;  %1043 = vmatpush.bf16.msra.mxu2 %v1023_v10 }
  0x3d   : > { %577 = vmatpush.bf16.msra.mxu1 %v1031_v11  ;;  %1051 = vmatpush.bf16.msra.mxu3 %v1031_v11 }
  0x40   : > { %529 = vmatpush.bf16.msra.mxu0 %v1022_v12  ;;  %1044 = vmatpush.bf16.msra.mxu2 %v1022_v12 }
  0x41   : > { %578 = vmatpush.bf16.msra.mxu1 %v1030_v13  ;;  %1052 = vmatpush.bf16.msra.mxu3 %v1030_v13 }
  0x44   : > { %530 = vmatpush.bf16.msra.mxu0 %v1021_v14  ;;  %1045 = vmatpush.bf16.msra.mxu2 %v1021_v14 }
  0x45   : > { %579 = vmatpush.bf16.msra.mxu1 %v1029_v15  ;;  %1053 = vmatpush.bf16.msra.mxu3 %v1029_v15 }
  0x47   : > { %531 = vmatmul.bf16.vlgmr.msra.gmra.mxu0 %v873_v24  ;;  %551 = vmatmul.bf16.vlgmr.msra.gmra.mxu2 %v905_v25 }
  0x48   : > { %580 = vmatmul.bf16.vlgmr.msra.gmra.mxu1 %v877_v26  ;;  %600 = vmatmul.bf16.vlgmr.msra.gmra.mxu3 %v909_v27 }
  0x57   : > { %536 = vmatmul.bf16.gmra.mxu0 %v881_v36  ;;  %556 = vmatmul.bf16.gmra.mxu2 %v913_v37 }
  0x58   : > { %585 = vmatmul.bf16.gmra.mxu1 %v885_v38  ;;  %605 = vmatmul.bf16.gmra.mxu3 %v917_v39 }
  0x67   : > { %541 = vmatmul.bf16.gmra.mxu0 %v889_v48  ;;  %561 = vmatmul.bf16.gmra.mxu2 %v921_v49 }
  0x68   : > { %590 = vmatmul.bf16.gmra.mxu1 %v893_v50  ;;  %610 = vmatmul.bf16.gmra.mxu3 %v925_v51 }
  0x77   : > { %546 = vmatmul.bf16.gmra.mxu0 %v897_v60  ;;  %566 = vmatmul.bf16.gmra.mxu2 %v929_v61 }
  0x78   : > { %595 = vmatmul.bf16.gmra.mxu1 %v901_v62  ;;  %615 = vmatmul.bf16.gmra.mxu3 %v933_v63 }
  0xc4   : > { %v532_v0 = vpop.f32.mrf.mxu0 }
  0xc5   : > { %v581_v2 = vpop.f32.mrf.mxu1 }
  0xc6   : > { %v582_v3 = vadd.f32 %v581_v2, %v532_v0 }
  0xc8   : > { %v676_v4 = vadd.f32 %v1458_v1, %v582_v3 }
  0xca   : > { %v692_v5 = vmax.f32 %v676_v4, 0.0  ;;  %v552_v6 = vpop.f32.mrf.mxu2 }
  0xcb   : > { %v601_v7 = vpop.f32.mrf.mxu3 }
  0xcc   : > { %708 = vst [vmem:[%s1463_s22] sm:$0xff] %v692_v5  ;;  %v602_v8 = vadd.f32 %v601_v7, %v552_v6  ;;  %v534_v9 = vpop.f32.mrf.mxu0 }
  0xcd   : > { %v583_v10 = vpop.f32.mrf.mxu1 }
  0xce   : > { %v684_v11 = vadd.f32 %v1458_v1, %v602_v8  ;;  %v584_v12 = vadd.f32 %v583_v10, %v534_v9 }
  0xd0   : > { %v700_v13 = vmax.f32 %v684_v11, 0.0  ;;  %v677_v14 = vadd.f32 %v1458_v1, %v584_v12 }
  0xd2   : > { %716 = vst [vmem:[%s1463_s22 + $0x40] sm:$0xff] %v700_v13  ;;  %v693_v15 = vmax.f32 %v677_v14, 0.0  ;;  %v554_v16 = vpop.f32.mrf.mxu2 }
  0xd3   : > { %v603_v17 = vpop.f32.mrf.mxu3 }
  0xd4   : > { %709 = vst [vmem:[%s1463_s22 + $0x8] sm:$0xff] %v693_v15  ;;  %v604_v18 = vadd.f32 %v603_v17, %v554_v16  ;;  %v537_v19 = vpop.f32.mrf.mxu0 }
  0xd5   : > { %v586_v20 = vpop.f32.mrf.mxu1 }
  0xd6   : > { %v685_v21 = vadd.f32 %v1458_v1, %v604_v18  ;;  %v587_v22 = vadd.f32 %v586_v20, %v537_v19 }
  0xd8   : > { %v701_v23 = vmax.f32 %v685_v21, 0.0  ;;  %v678_v24 = vadd.f32 %v1458_v1, %v587_v22 }
  0xda   : > { %717 = vst [vmem:[%s1463_s22 + $0x48] sm:$0xff] %v701_v23  ;;  %v694_v25 = vmax.f32 %v678_v24, 0.0  ;;  %v557_v26 = vpop.f32.mrf.mxu2 }
  0xdb   : > { %v606_v27 = vpop.f32.mrf.mxu3 }
  0xdc   : > { %710 = vst [vmem:[%s1463_s22 + $0x10] sm:$0xff] %v694_v25  ;;  %v607_v28 = vadd.f32 %v606_v27, %v557_v26  ;;  %v539_v29 = vpop.f32.mrf.mxu0 }
  0xdd   : > { %v588_v30 = vpop.f32.mrf.mxu1 }
  0xde   : > { %v686_v31 = vadd.f32 %v1458_v1, %v607_v28  ;;  %v589_v32 = vadd.f32 %v588_v30, %v539_v29 }
  0xe0   : > { %v702_v33 = vmax.f32 %v686_v31, 0.0  ;;  %v679_v34 = vadd.f32 %v1458_v1, %v589_v32 }
  0xe2   : > { %718 = vst [vmem:[%s1463_s22 + $0x50] sm:$0xff] %v702_v33  ;;  %v695_v35 = vmax.f32 %v679_v34, 0.0  ;;  %v559_v36 = vpop.f32.mrf.mxu2 }
  0xe3   : > { %v608_v37 = vpop.f32.mrf.mxu3 }
  0xe4   : > { %711 = vst [vmem:[%s1463_s22 + $0x18] sm:$0xff] %v695_v35  ;;  %v609_v38 = vadd.f32 %v608_v37, %v559_v36  ;;  %v542_v39 = vpop.f32.mrf.mxu0 }
  0xe5   : > { %v591_v40 = vpop.f32.mrf.mxu1 }
  0xe6   : > { %v687_v41 = vadd.f32 %v1458_v1, %v609_v38  ;;  %v592_v42 = vadd.f32 %v591_v40, %v542_v39 }
  0xe8   : > { %v703_v43 = vmax.f32 %v687_v41, 0.0  ;;  %v680_v44 = vadd.f32 %v1458_v1, %v592_v42 }
  0xea   : > { %719 = vst [vmem:[%s1463_s22 + $0x58] sm:$0xff] %v703_v43  ;;  %v696_v45 = vmax.f32 %v680_v44, 0.0  ;;  %v562_v46 = vpop.f32.mrf.mxu2 }
  0xeb   : > { %v611_v47 = vpop.f32.mrf.mxu3 }
  0xec   : > { %712 = vst [vmem:[%s1463_s22 + $0x20] sm:$0xff] %v696_v45  ;;  %v612_v48 = vadd.f32 %v611_v47, %v562_v46  ;;  %v544_v49 = vpop.f32.mrf.mxu0 }
  0xed   : > { %v593_v50 = vpop.f32.mrf.mxu1 }
  0xee   : > { %v688_v51 = vadd.f32 %v1458_v1, %v612_v48  ;;  %v594_v52 = vadd.f32 %v593_v50, %v544_v49 }
  0xf0   : > { %v704_v53 = vmax.f32 %v688_v51, 0.0  ;;  %v681_v54 = vadd.f32 %v1458_v1, %v594_v52 }
  0xf2   : > { %720 = vst [vmem:[%s1463_s22 + $0x60] sm:$0xff] %v704_v53  ;;  %v697_v55 = vmax.f32 %v681_v54, 0.0  ;;  %v564_v56 = vpop.f32.mrf.mxu2 }
  0xf3   : > { %v613_v57 = vpop.f32.mrf.mxu3 }
  0xf4   : > { %713 = vst [vmem:[%s1463_s22 + $0x28] sm:$0xff] %v697_v55  ;;  %v614_v58 = vadd.f32 %v613_v57, %v564_v56  ;;  %v547_v59 = vpop.f32.mrf.mxu0 }
  0xf5   : > { %v596_v60 = vpop.f32.mrf.mxu1 }
  0xf6   : > { %v689_v61 = vadd.f32 %v1458_v1, %v614_v58  ;;  %v597_v62 = vadd.f32 %v596_v60, %v547_v59 }
  0xf8   : > { %v705_v63 = vmax.f32 %v689_v61, 0.0  ;;  %v682_v0 = vadd.f32 %v1458_v1, %v597_v62 }
  0xfa   : > { %721 = vst [vmem:[%s1463_s22 + $0x68] sm:$0xff] %v705_v63  ;;  %v698_v2 = vmax.f32 %v682_v0, 0.0  ;;  %v567_v3 = vpop.f32.mrf.mxu2 }
  0xfb   : > { %v616_v4 = vpop.f32.mrf.mxu3 }
  0xfc   : > { %714 = vst [vmem:[%s1463_s22 + $0x30] sm:$0xff] %v698_v2  ;;  %v617_v5 = vadd.f32 %v616_v4, %v567_v3  ;;  %v549_v6 = vpop.f32.mrf.mxu0 }
  0xfd   : > { %v598_v7 = vpop.f32.mrf.mxu1 }
  0xfe   : > { %v690_v8 = vadd.f32 %v1458_v1, %v617_v5  ;;  %v599_v9 = vadd.f32 %v598_v7, %v549_v6 }
 0x100   : > { %v706_v10 = vmax.f32 %v690_v8, 0.0  ;;  %v683_v11 = vadd.f32 %v1458_v1, %v599_v9 }
 0x102   : > { %722 = vst [vmem:[%s1463_s22 + $0x70] sm:$0xff] %v706_v10  ;;  %v699_v12 = vmax.f32 %v683_v11, 0.0  ;;  %v569_v13 = vpop.f32.mrf.mxu2 }
 0x103   : > { %v618_v14 = vpop.f32.mrf.mxu3 }
 0x104   : > { %715 = vst [vmem:[%s1463_s22 + $0x38] sm:$0xff] %v699_v12  ;;  %v619_v15 = vadd.f32 %v618_v14, %v569_v13 }
 0x106   : > { %v691_v16 = vadd.f32 %v1458_v1, %v619_v15 }
 0x108   : > { %v707_v17 = vmax.f32 %v691_v16, 0.0 }
 0x10a   : > { %723 = vst [vmem:[%s1463_s22 + $0x78] sm:$0xff] %v707_v17 }
 0x10b   : > { %1221 = shalt.err (!%p1218_p12)
}
 0x10c   : > { %s1287_s6 = smov 128   ;;  %s1288_s19 = smov 8  }
 0x10d   : > { %1060 = dma.vmem_to_hbm [thread:$0]  (%p1387_p3), %s739_s25, 2048, %s741_s26, %s725_s15, %s1287_s6, %s1287_s6, %s1288_s19  }
 0x10e PF: > { %p1077_p13 = scmp.ge.s32.totalorder %s1280_s17, 2  ;;  %s755_s1 = sand.u32 1, %s1260_s12  }
 0x10f   : > { %s756_s20 = scalar_lea.sflag [#allocation5], %s755_s1 }
 0x110   : > { %p1071_p0 = pnand %p1077_p13, %p1358_p6 }
 0x112   : > { %p1072_p5 = pneg %p1071_p0 }
 0x114   : > { %1255 = dma.done.wait (%p1072_p5), %s756_s20, 2048  }
 0x115   : > { %1257 = vsyncadd (%p1072_p5), %s756_s20, 4294965248  ;;  %s20_s17 = sadd.s32 1, %s1280_s17   ;;  %s1547_s12 = smov %s1264_s13 }
 0x116   : > { %p17_p7 = scmp.ge.s32.totalorder %s20_s17, 6   ;;  %s1548_s13 = smov %s1268_s14 }
 0x117   : > { %s1549_s14 = smov %s1396_s18  ;;  %s1550_s15 = smov %s1276_s16 }
 0x118   : > { %s1551_s16 = smov %s1553_s5  ;;  %19 = sbr.rel (!%p17_p7) target bundleno = 9 (0x9), region = 93 }
 0x11d   :  { %762 = vsyncpa [#allocation4], 1 }
 0x11e   :  { %764 = vsyncpa [#allocation4 + $0x1], 1 }
 0x11f   :  { %765 = vsyncpa [#allocation7], 1 }
 0x120   :  { %766 = vsyncpa [#allocation5], 1 }
 0x121   :  { %768 = vsyncpa [#allocation5 + $0x1], 1 }

</bundles_post_ra>
